<compile_context>
chip_gen: v7x
topology: tpu7x:2x2x1
jax: 0.10.0
libtpu: 0.0.40
codegen_flags: <defaults>
</compile_context>

<pallas_src>
from functools import partial

import jax
import jax.numpy as jnp
from jax import lax
from jax.experimental import pallas as pl
from jax.experimental.pallas import tpu as pltpu

# ---------------- small demo config (module is shape-generic) ----------------
BATCH = 2
IN_TOKENS = 16
OUT_TOKENS = 8
IN_FEATURES = 32
OUT_FEATURES = 128          # multiple of 128 -> lane-dense output stores, aligned v' slices
NUM_HEADS = 4
HEAD_DIM = IN_FEATURES // NUM_HEADS      # 8   (q/k head dim, defines the scale)
V_HEAD_DIM = OUT_FEATURES // NUM_HEADS   # 32  (v head dim)
SCALE = HEAD_DIM ** -0.5

assert IN_FEATURES % NUM_HEADS == 0 and OUT_FEATURES % NUM_HEADS == 0
# perf-only guard: keeps output stores unmasked and per-head value slices 128-aligned
assert OUT_FEATURES % 128 == 0, "out_features should be a multiple of 128 for lane-dense stores"


# ---------------- fused Pallas kernel: whole RABlock forward, one batch / step ----------------
def rablock_kernel(x_ref, w_ref, bo_ref, o_ref, *, num_heads):
    """
    x_ref  : (M, Din)             f32 input tokens (cast to bf16 for the MXU)
    w_ref  : (Din, H*Dout + H*N)  bf16 fused weight  [ Wv_h@Wo_h (per head) | scale*Wk_h@q_h^T (per head) ]
    bo_ref : (1, Dout)            f32 to_out bias
    o_ref  : (N, Dout)            f32 output block (exactly one (8,128) vreg)
    """
    M, _ = x_ref.shape
    N, Dout = o_ref.shape
    H = num_heads
    HD = H * Dout

    xb = x_ref[...].astype(jnp.bfloat16)

    # ONE bf16 MXU contraction produces both the per-head value projections (Wo already
    # folded in) and all H*N attention logits (scale, Wk and the learned q folded in).
    proj = jnp.dot(xb, w_ref[...], preferred_element_type=jnp.float32)   # (M, H*Dout + H*N)

    # --- softmax over keys for all (head, query) columns at once; f32 math ---
    scores = proj[:, HD:]                                    # (M, H*N)  keys on sublanes
    s_max = jnp.max(scores, axis=0, keepdims=True)
    p = jnp.exp(scores - s_max)
    inv = pl.reciprocal(jnp.sum(p, axis=0, keepdims=True), approx=False)   # EUP slot
    att = (p * inv).astype(jnp.bfloat16)                     # (M, H*N)

    vproj = proj[:, :HD].astype(jnp.bfloat16)                # (M, H*Dout), 128-aligned per head

    # y = bo + sum_h att_h^T @ v'_h   (H bf16 MXU contractions over the key axis)
    y = jnp.broadcast_to(bo_ref[...], (N, Dout))             # hoisted once, not per head
    for h in range(H):                                       # H=4, unrolled at trace time
        y = y + lax.dot_general(
            att[:, h * N:(h + 1) * N],                       # (M, N)
            vproj[:, h * Dout:(h + 1) * Dout],               # (M, Dout)
            (((0,), (0,)), ((), ())),                        # contract keys (dim 0) of both
            preferred_element_type=jnp.float32)
    o_ref[...] = y.astype(o_ref.dtype)


# ---------------- wrapper ----------------
def rablock_forward(x, kparams, *, num_heads=NUM_HEADS):
    B, M, Din = x.shape
    w_proj = kparams["w_proj"]
    bo = kparams["bo"]
    Dout = bo.shape[1]
    N = (w_proj.shape[1] - num_heads * Dout) // num_heads

    kern = partial(rablock_kernel, num_heads=num_heads)
    out = pl.pallas_call(
        kern,
        out_shape=jax.ShapeDtypeStruct((B, N, Dout), jnp.float32),
        grid=(B,),   # one batch element per step; "parallel" -> both TCs on v7x megacore
        in_specs=[
            pl.BlockSpec((None, M, Din), lambda b: (b, 0, 0)),   # x[b]      (squeezed batch dim)
            pl.BlockSpec(w_proj.shape, lambda b: (0, 0)),        # fused weight (same block every step)
            pl.BlockSpec(bo.shape, lambda b: (0, 0)),            # bias
        ],
        out_specs=pl.BlockSpec((None, N, Dout), lambda b: (b, 0, 0)),
        compiler_params=pltpu.CompilerParams(dimension_semantics=("parallel",)),
    )(x, w_proj, bo)
    return out


# ---------------- parameter init (PyTorch-equivalent) ----------------
def init_params(key):
    kq, kk, kv_, ko, kb = jax.random.split(key, 5)
    bnd_in = 1.0 / (IN_FEATURES ** 0.5)
    bnd_out = 1.0 / (OUT_FEATURES ** 0.5)
    return {
        # nn.Parameter(torch.zeros(1, out_tokens, in_features)).normal_()
        "q": jax.random.normal(kq, (1, OUT_TOKENS, IN_FEATURES), jnp.float32),
        # Linear weights stored transposed to (in_features, out_features): y = x @ W
        "wk": jax.random.uniform(kk, (IN_FEATURES, IN_FEATURES), jnp.float32, -bnd_in, bnd_in),
        "wv": jax.random.uniform(kv_, (IN_FEATURES, OUT_FEATURES), jnp.float32, -bnd_in, bnd_in),
        "wo": jax.random.uniform(ko, (OUT_FEATURES, OUT_FEATURES), jnp.float32, -bnd_out, bnd_out),
        "bo": jax.random.uniform(kb, (1, OUT_FEATURES), jnp.float32, -bnd_out, bnd_out),
    }


def prepare_kernel_params(params):
    """One-time, setup-side algebra (paid once, not per forward):
       * fold scale, Wk and the learned q into a single score weight (Din, H*N)
       * fold Wo into Wv per head:  Wvo_h = Wv_h @ Wo_h  -> (Din, H*Dout)
       * concatenate [Wvo | Wscore] into ONE bf16 projection weight.
    """
    q = params["q"][0]                                   # (N, Din)
    wk, wv, wo = params["wk"], params["wv"], params["wo"]
    H, hd, vd = NUM_HEADS, HEAD_DIM, V_HEAD_DIM

    w_score = jnp.concatenate(
        [SCALE * (wk[:, h * hd:(h + 1) * hd] @ q[:, h * hd:(h + 1) * hd].T) for h in range(H)],
        axis=1)                                          # (Din, H*N)
    w_vo = jnp.concatenate(
        [wv[:, h * vd:(h + 1) * vd] @ wo[h * vd:(h + 1) * vd, :] for h in range(H)],
        axis=1)                                          # (Din, H*Dout)
    w_proj = jnp.concatenate([w_vo, w_score], axis=1).astype(jnp.bfloat16)   # (Din, H*Dout + H*N)

    return {"w_proj": w_proj, "bo": params["bo"].astype(jnp.float32)}


# ---------------- pure-JAX reference (sanity check) ----------------
def rablock_reference(x, params):
    B, M, Din = x.shape
    q = params["q"]                           # (1, N, Din)
    N = q.shape[1]
    k = x @ params["wk"]                      # (B, M, Din)
    v = x @ params["wv"]                      # (B, M, Dout)
    Dout = v.shape[-1]
    H, hd, vd = NUM_HEADS, HEAD_DIM, V_HEAD_DIM

    qh = q.reshape(1, N, H, hd).transpose(0, 2, 1, 3)[0]   # (H, N, hd)
    kh = k.reshape(B, M, H, hd).transpose(0, 2, 1, 3)      # (B, H, M, hd)
    vh = v.reshape(B, M, H, vd).transpose(0, 2, 1, 3)      # (B, H, M, vd)

    sim = jnp.einsum('hil,bhjl->bhij', qh, kh) * SCALE     # (B, H, N, M)
    att = jax.nn.softmax(sim, axis=-1)                      # dropout(p=0) = identity
    out = jnp.einsum('bhij,bhjd->bhid', att, vh)            # (B, H, N, vd)
    out = out.transpose(0, 2, 1, 3).reshape(B, N, Dout)
    return out @ params["wo"] + params["bo"]


if __name__ == "__main__":
    key = jax.random.PRNGKey(0)
    kx, kp = jax.random.split(key)
    params = init_params(kp)
    x = jax.random.normal(kx, (BATCH, IN_TOKENS, IN_FEATURES), jnp.float32)

    kparams = prepare_kernel_params(params)
    out = rablock_forward(x, kparams)
    out = jax.block_until_ready(out)

    ref = rablock_reference(x, params)
    assert out.shape == (BATCH, OUT_TOKENS, OUT_FEATURES)
    # tolerance covers bf16 MXU operands (weights/activations rounded to bf16)
    assert jnp.allclose(out, ref, atol=2e-2, rtol=2e-2), "Pallas output mismatch vs reference"

    print("KERNEL_OK")
</pallas_src>

<mosaic_0001>
module attributes {stable_mosaic.version = 11 : i64} {
  func.func @rablock_kernel(%arg0: i32, %arg1: memref<1x16x32xf32, #tpu.memory_space<vmem>>, %arg2: memref<32x544xbf16, #tpu.memory_space<vmem>>, %arg3: memref<1x128xf32, #tpu.memory_space<vmem>>, %arg4: memref<1x8x128xf32, #tpu.memory_space<vmem>>) attributes {dimension_semantics = [#tpu.dimension_semantics<parallel>], iteration_bounds = array<i64: 2>, scalar_prefetch = 0 : i64, scratch_operands = 0 : i64, tpu.core_type = #tpu.core_type<tc>, window_params = [{transform_indices = @transform_0, window_bounds = array<i64: 1, 16, 32>}, {pipeline_mode = #tpu.pipeline_mode<synchronous>, transform_indices = @transform_1, window_bounds = array<i64: 32, 544>}, {pipeline_mode = #tpu.pipeline_mode<synchronous>, transform_indices = @transform_2, window_bounds = array<i64: 1, 128>}, {transform_indices = @transform_3, window_bounds = array<i64: 1, 8, 128>}]} {
    %c0 = arith.constant 0 : index
    %c0_0 = arith.constant 0 : index
    %c0_1 = arith.constant 0 : index
    %0 = vector.load %arg1[%c0, %c0_0, %c0_1] : memref<1x16x32xf32, #tpu.memory_space<vmem>>, vector<1x16x32xf32>
    %1 = vector.shape_cast %0 : vector<1x16x32xf32> to vector<16x32xf32>
    %2 = arith.truncf %1 : vector<16x32xf32> to vector<16x32xbf16>
    %c0_2 = arith.constant 0 : index
    %c0_3 = arith.constant 0 : index
    %3 = vector.load %arg2[%c0_2, %c0_3] : memref<32x544xbf16, #tpu.memory_space<vmem>>, vector<32x544xbf16>
    %cst = arith.constant dense<0.000000e+00> : vector<16x544xf32>
    %4 = tpu.matmul %2, %3, %cst {dimension_numbers = #tpu.dot_dimension_numbers<[1], [0], [0], [1], [0, 0, 1, 1], [], []>} : vector<16x32xbf16>, vector<32x544xbf16>, vector<16x544xf32> -> vector<16x544xf32>
    %5 = vector.extract_strided_slice %4 {offsets = [0, 512], sizes = [16, 32], strides = [1, 1]} : vector<16x544xf32> to vector<16x32xf32>
    %cst_4 = arith.constant dense<0xFF800000> : vector<32xf32>
    %6 = vector.multi_reduction <maximumf>, %5, %cst_4 [0] : vector<16x32xf32> to vector<32xf32>
    %7 = vector.shape_cast %6 : vector<32xf32> to vector<1x32xf32>
    %8 = vector.broadcast %7 : vector<1x32xf32> to vector<16x32xf32>
    %9 = arith.subf %5, %8 : vector<16x32xf32>
    %10 = math.exp %9 : vector<16x32xf32>
    %cst_5 = arith.constant dense<0.000000e+00> : vector<32xf32>
    %11 = vector.multi_reduction <add>, %10, %cst_5 [0] : vector<16x32xf32> to vector<32xf32>
    %12 = vector.shape_cast %11 : vector<32xf32> to vector<1x32xf32>
    %13 = tpu.reciprocal %12 : vector<1x32xf32> -> vector<1x32xf32>
    %14 = vector.broadcast %13 : vector<1x32xf32> to vector<16x32xf32>
    %15 = arith.mulf %10, %14 : vector<16x32xf32>
    %16 = arith.truncf %15 : vector<16x32xf32> to vector<16x32xbf16>
    %17 = vector.extract_strided_slice %4 {offsets = [0, 0], sizes = [16, 512], strides = [1, 1]} : vector<16x544xf32> to vector<16x512xf32>
    %18 = arith.truncf %17 : vector<16x512xf32> to vector<16x512xbf16>
    %c0_6 = arith.constant 0 : index
    %c0_7 = arith.constant 0 : index
    %19 = vector.load %arg3[%c0_6, %c0_7] : memref<1x128xf32, #tpu.memory_space<vmem>>, vector<1x128xf32>
    %20 = vector.shape_cast %19 : vector<1x128xf32> to vector<1x128xf32>
    %21 = vector.broadcast %20 : vector<1x128xf32> to vector<8x128xf32>
    %22 = vector.extract_strided_slice %16 {offsets = [0, 0], sizes = [16, 8], strides = [1, 1]} : vector<16x32xbf16> to vector<16x8xbf16>
    %23 = vector.extract_strided_slice %18 {offsets = [0, 0], sizes = [16, 128], strides = [1, 1]} : vector<16x512xbf16> to vector<16x128xbf16>
    %cst_8 = arith.constant dense<0.000000e+00> : vector<8x128xf32>
    %24 = tpu.matmul %22, %23, %cst_8 {dimension_numbers = #tpu.dot_dimension_numbers<[0], [0], [1], [1], [0, 1, 1, 1], [], []>} : vector<16x8xbf16>, vector<16x128xbf16>, vector<8x128xf32> -> vector<8x128xf32>
    %25 = arith.addf %21, %24 : vector<8x128xf32>
    %26 = vector.extract_strided_slice %16 {offsets = [0, 8], sizes = [16, 8], strides = [1, 1]} : vector<16x32xbf16> to vector<16x8xbf16>
    %27 = vector.extract_strided_slice %18 {offsets = [0, 128], sizes = [16, 128], strides = [1, 1]} : vector<16x512xbf16> to vector<16x128xbf16>
    %cst_9 = arith.constant dense<0.000000e+00> : vector<8x128xf32>
    %28 = tpu.matmul %26, %27, %cst_9 {dimension_numbers = #tpu.dot_dimension_numbers<[0], [0], [1], [1], [0, 1, 1, 1], [], []>} : vector<16x8xbf16>, vector<16x128xbf16>, vector<8x128xf32> -> vector<8x128xf32>
    %29 = arith.addf %25, %28 : vector<8x128xf32>
    %30 = vector.extract_strided_slice %16 {offsets = [0, 16], sizes = [16, 8], strides = [1, 1]} : vector<16x32xbf16> to vector<16x8xbf16>
    %31 = vector.extract_strided_slice %18 {offsets = [0, 256], sizes = [16, 128], strides = [1, 1]} : vector<16x512xbf16> to vector<16x128xbf16>
    %cst_10 = arith.constant dense<0.000000e+00> : vector<8x128xf32>
    %32 = tpu.matmul %30, %31, %cst_10 {dimension_numbers = #tpu.dot_dimension_numbers<[0], [0], [1], [1], [0, 1, 1, 1], [], []>} : vector<16x8xbf16>, vector<16x128xbf16>, vector<8x128xf32> -> vector<8x128xf32>
    %33 = arith.addf %29, %32 : vector<8x128xf32>
    %34 = vector.extract_strided_slice %16 {offsets = [0, 24], sizes = [16, 8], strides = [1, 1]} : vector<16x32xbf16> to vector<16x8xbf16>
    %35 = vector.extract_strided_slice %18 {offsets = [0, 384], sizes = [16, 128], strides = [1, 1]} : vector<16x512xbf16> to vector<16x128xbf16>
    %cst_11 = arith.constant dense<0.000000e+00> : vector<8x128xf32>
    %36 = tpu.matmul %34, %35, %cst_11 {dimension_numbers = #tpu.dot_dimension_numbers<[0], [0], [1], [1], [0, 1, 1, 1], [], []>} : vector<16x8xbf16>, vector<16x128xbf16>, vector<8x128xf32> -> vector<8x128xf32>
    %37 = arith.addf %33, %36 : vector<8x128xf32>
    %c0_12 = arith.constant 0 : index
    %c0_13 = arith.constant 0 : index
    %c0_14 = arith.constant 0 : index
    %38 = vector.load %arg4[%c0_12, %c0_13, %c0_14] : memref<1x8x128xf32, #tpu.memory_space<vmem>>, vector<1x8x128xf32>
    %39 = vector.shape_cast %38 : vector<1x8x128xf32> to vector<8x128xf32>
    %40 = vector.shape_cast %37 : vector<8x128xf32> to vector<1x8x128xf32>
    tpu.vector_store %arg4[%c0_12, %c0_13, %c0_14], %40 {strides = array<i32>} : memref<1x8x128xf32, #tpu.memory_space<vmem>>, vector<1x8x128xf32>,
    return
  }
  func.func @transform_0(%arg0: i32) -> (i32, i32, i32) {
    %c0_i32 = arith.constant 0 : i32
    %c0_i32_0 = arith.constant 0 : i32
    %c0_i32_1 = arith.constant 0 : i32
    return %arg0, %c0_i32, %c0_i32_0 : i32, i32, i32
  }
  func.func @transform_1(%arg0: i32) -> (i32, i32) {
    %c0_i32 = arith.constant 0 : i32
    %c0_i32_0 = arith.constant 0 : i32
    %c0_i32_1 = arith.constant 0 : i32
    return %c0_i32, %c0_i32_0 : i32, i32
  }
  func.func @transform_2(%arg0: i32) -> (i32, i32) {
    %c0_i32 = arith.constant 0 : i32
    %c0_i32_0 = arith.constant 0 : i32
    %c0_i32_1 = arith.constant 0 : i32
    return %c0_i32, %c0_i32_0 : i32, i32
  }
  func.func @transform_3(%arg0: i32) -> (i32, i32, i32) {
    %c0_i32 = arith.constant 0 : i32
    %c0_i32_0 = arith.constant 0 : i32
    %c0_i32_1 = arith.constant 0 : i32
    return %arg0, %c0_i32, %c0_i32_0 : i32, i32, i32
  }
}

</mosaic_0001>

<bundles_post_ra>
// kernel: tpu_custom_call.1
= control target key start
LH: loop header
LB: loop body
LE: loop exit
PB: predicated region body
PF: predicated region fallthrough
CT: control target
= control target key end

     0   :  { %8 = vsyncpa [#allocation3], 0  ;;  %s1367_s0 = inlined_call_operand.hbm [shape: f32[2,16,32], index: 0, kind: input, shape index: {}]   ;;  %s1368_s1 = inlined_call_operand.hbm [shape: bf16[32,544], index: 1, kind: input, shape index: {}]   ;;  %s1369_s2 = inlined_call_operand.vmem [shape: f32[1,128], index: 2, kind: input, shape index: {}]   ;;  %s1370_s3 = inlined_call_operand.hbm [shape: f32[2,8,128], index: 3, kind: output, shape index: {}]  }
   0x1   :  { %10 = vsyncpa [#allocation3 + $0x1], 0 }
   0x2   :  { %11 = vsyncpa [#allocation6], 0 }
   0x3   :  { %12 = vsyncpa [#allocation4], 0 }
   0x4   :  { %14 = vsyncpa [#allocation4 + $0x1], 0  ;;  %s1128_s12 = smov 0   ;;  %s1130_s13 = smov 0  }
   0x5   :  { %s1132_s14 = smov 0   ;;  %s1134_s15 = smov 0  }
   0x6 LB: > { %s1149_s16 = sadd.s32 4294967295, %s1093_s15   ;;  %s788_s17 = sadd.s32 4294967294, %s1093_s15   ;;  %s1093_s15 = sphi %s1134_s15, %s1390_s15   ;;  %s1089_s14 = sphi %s1132_s14, %s1389_s14   ;;  %s1085_s13 = sphi %s1130_s13, %s1388_s13   ;;  %s1081_s12 = sphi %s1128_s12, %s1387_s12  }
   0x7   : > { %p40_p0 = scmp.ne.s32.totalorder %s1085_s13, %s1081_s12  ;;  %p1371_p1 = scmp.eq.s32.totalorder %s1149_s16, 0 }
   0x8   : > { %p112_p3 = scmp.eq.s32.totalorder %s788_s17, 1  ;;  %p789_p5 = scmp.ge.s32.totalorder %s1093_s15, 1 }
   0x9   : > { %p1158_p4 = por %p1371_p1, %p40_p0  ;;  %p119_p7 = scmp.lt.s32.totalorder %s1093_s15, 3 }
   0xa   : > { %p1163_p6 = por %p112_p3, %p40_p0  ;;  %s1095_s21 = smov [#allocation5]  }
   0xb   : > { %s1374_s18 = scalar_select %p1158_p4, 1, 0 }
   0xc   : > { %s1375_s19 = scalar_select %p1163_p6, 1, 0 }
   0xd   : > { %p1168_p8 = pnand %p789_p5, %p119_p7  ;;  %s131_s22 = sshll.u32 %s1095_s21, 4  ;;  %s1172_s22 = int_to_ptr.vmem [resolvable:$true] %s131_s22 }
   0xe   : > { %s1184_s24 = sadd.s32 1, %s1093_s15   ;;  %s27_s25 = sadd.s32 1, %s1089_s14 }
   0xf   : > { %s1376_s20 = scalar_select %p1168_p8, 1, 0 }
  0x10   : > { %p886_p9 = pneg %p1168_p8  ;;  %s24_s26 = ssub.s32 %s1093_s15, %s1184_s24 }
  0x11   : > { %s965_s29 = scalar_lea.hbm %s1368_s1, 1280 }
  0x12   : > { %p1179_p11 = pnand %p886_p9, %p1371_p1  ;;  %p966_p12 = scmp.ne.s32.totalorder %s1368_s1, %s965_s29 }
  0x13   : > { %p972_p5 = scmp.lt.u32.totalorder %s965_s29, %s1368_s1 }
  0x14   : > { %p967_p13 = pneg %p1179_p11 }
  0x16   : > { %p968_p0 = pnand %p967_p13, %p966_p12 }
  0x18   : > { %p969_p3 = pneg %p968_p0 }
  0x1a   : > { %p974_p7 = pnand %p972_p5, %p969_p3 }
  0x1c   : > { %977 = shalt.err (!%p974_p7)
}
  0x1d   : > { %s978_s7 = scalar_lea.vmem %s1172_s22, 1280  ;;  %p986_p2 = scmp.lt.s32.totalorder %s1172_s22, %s1172_s22 }
  0x1e   : > { %p979_p9 = scmp.ne.s32.totalorder %s1172_s22, %s978_s7  ;;  %p987_p6 = scmp.lt.s32.totalorder %s978_s7, %s978_s7 }
  0x20   : > { %p981_p10 = pnand %p979_p9, %p967_p13  ;;  %p988_p4 = por %p987_p6, %p986_p2 }
  0x22   : > { %p982_p1 = pneg %p981_p10 }
  0x24   : > { %p989_p8 = pnand %p988_p4, %p982_p1 }
  0x26   : > { %992 = shalt.err (!%p989_p8)
}
  0x27   : > { %s1096_s8 = smov 320   ;;  %s1097_s9 = smov 20  }
  0x28   : > { %889 = dma.hbm_to_vmem [thread:$0]  (!%p1179_p11), %s1368_s1, 1280, %s1172_s22, [#allocation6], %s1096_s8, %s1096_s8, %s1097_s9  }
  0x29   : > { %p25_p2 = scmp.eq.s32.totalorder %s24_s26, 0  ;;  %p34_p1 = scmp.ne.s32.totalorder %s1089_s14, %s1085_s13 }
  0x2a   : > { %p35_p4 = scmp.eq.s32.totalorder %s1093_s15, 0  ;;  %p899_p6 = scmp.lt.s32.totalorder %s1093_s15, 2 }
  0x2b   : > { %s1215_s17 = scalar_select %p25_p2, %s1089_s14, %s27_s25  }
  0x2c   : > { %p36_p8 = por %p35_p4, %p34_p1  ;;  %p1378_p10 = scmp.eq.s32.totalorder %s1149_s16, 1 }
  0x2d   : > { %s148_s27 = sand.u32 1, %s1089_s14   ;;  %s821_s28 = sshll.u32 %s1093_s15, 8 }
  0x2e   : > { %p1219_p12 = por %p1378_p10, %p34_p1  ;;  %s792_s29 = sshll.u32 %s148_s27, 4 }
  0x2f   : > { %s1228_s4 = scalar_lea.hbm %s1367_s0, %s821_s28  ;;  %s152_s22 = scalar_lea.vmem [#allocation2], %s792_s29 }
  0x30   : > { %s159_s25 = sshll.u32 %s152_s22, 4  ;;  %p1230_p11 = pnand %p899_p6, %p36_p8  ;;  %s1234_s25 = int_to_ptr.vmem [resolvable:$true] %s159_s25 }
  0x31   : > { %s1236_s5 = scalar_lea.sflag [#allocation3], %s148_s27  ;;  %s993_s6 = scalar_lea.hbm %s1228_s4, 256 }
  0x32   : > { %p994_p13 = scmp.ne.s32.totalorder %s1228_s4, %s993_s6  ;;  %p995_p0 = pneg %p1230_p11 }
  0x33   : > { %s998_s9 = scalar_lea.hbm %s1367_s0, 512  ;;  %p999_p7 = scmp.lt.u32.totalorder %s1228_s4, %s1367_s0 }
  0x34   : > { %p996_p3 = pnand %p995_p0, %p994_p13  ;;  %p1000_p9 = scmp.lt.u32.totalorder %s998_s9, %s993_s6 }
  0x35   : > { %p1002_p1 = scmp.lt.u32.totalorder %s993_s6, %s1228_s4 }
  0x36   : > { %p997_p5 = pneg %p996_p3  ;;  %p1001_p2 = por %p1000_p9, %p999_p7 }
  0x38   : > { %p1003_p4 = por %p1002_p1, %p1001_p2 }
  0x3a   : > { %p1004_p6 = pnand %p1003_p4, %p997_p5 }
  0x3c   : > { %1007 = shalt.err (!%p1004_p6)
}
  0x3d   : > { %s1008_s27 = scalar_lea.vmem %s1234_s25, 256  ;;  %s1098_s28 = smov [#allocation2]  }
  0x3e   : > { %p1009_p8 = scmp.ne.s32.totalorder %s1234_s25, %s1008_s27  ;;  %s1013_s29 = sshll.u32 %s1098_s28, 4  ;;  %s1014_s29 = int_to_ptr.vmem [resolvable:$false] %s1013_s29 }
  0x3f   : > { %s1015_s23 = scalar_lea.vmem %s1014_s29, 512  ;;  %p1016_p3 = scmp.lt.s32.totalorder %s1234_s25, %s1014_s29 }
  0x40   : > { %p1011_p10 = pnand %p1009_p8, %p995_p0  ;;  %p1017_p7 = scmp.lt.s32.totalorder %s1015_s23, %s1008_s27 }
  0x42   : > { %p1012_p13 = pneg %p1011_p10  ;;  %p1018_p9 = por %p1017_p7, %p1016_p3 }
  0x44   : > { %p1019_p2 = pnand %p1018_p9, %p1012_p13 }
  0x46   : > { %1022 = shalt.err (!%p1019_p2)
}
  0x47   : > { %s1099_s30 = smov 128   ;;  %s1100_s22 = smov 8  }
  0x48   : > { %893 = dma.hbm_to_vmem [thread:$0]  (!%p1230_p11), %s1228_s4, 256, %s1234_s25, %s1236_s5, %s1099_s30, %s1099_s30, %s1100_s22  }
  0x49   : > { %p1381_p0 = scmp.ne.s32.totalorder %s1376_s20, 0 }
  0x4a   : > { %s1267_s6 = sand.u32 (!%p1381_p0), 1, %s1085_s13   ;;  %p1382_p5 = scmp.ne.s32.totalorder (!%p1381_p0), %s1374_s18, 0 }
  0x4b   : > { %171 = sbr.rel (%p1381_p0) target bundleno = 857 (0x359), region = 32  ;;  %s796_s7 = sshll.u32 (!%p1381_p0), %s1267_s6, 4 }
  0x4c   : > { %s174_s8 = scalar_lea.sflag (!%p1381_p0), [#allocation3], %s1267_s6  ;;  %s177_s9 = scalar_lea.vmem (!%p1381_p0), [#allocation2], %s796_s7 }
  0x52   : > { %1068 = dma.done.wait (%p1382_p5), %s174_s8, 256  }
  0x53   : > { %1070 = vsyncadd (%p1382_p5), %s174_s8, 4294967040  ;;  %p1383_p1 = scmp.eq.s32.totalorder %s1149_s16, 0 }
  0x55   : > { %1072 = dma.done.wait (%p1383_p1), [#allocation6], 1280   ;;  %p1384_p11 = pmov %p1383_p1 }
  0x56   : > { %v1101_v0 = vmov 0   ;;  %v1102_v1 = vmov 0.0   ;;  %vm1103_vm0 = vmmov 0   ;;  %v945_v2 = vld [vmem:[#allocation5 + $0x4] ss:$20 sps:$4 sm:$0xff]   ;;  %vm272_vm1 = vcmask 261120  }
  0x57   : > { %1074 = vsyncadd (%p1384_p11), [#allocation6], 4294966016  ;;  %308 = vmatprep.mubr.bf16.mxu0 %v1101_v0  ;;  %841 = vmatprep.subr.bf16.mxu1 %v1102_v1  ;;  %v947_v3 = vld [vmem:[#allocation5] ss:$20 sps:$4 sm:$0xff]   ;;  %v950_v5 = vld [vmem:[#allocation5 + $0x28] ss:$20 sps:$4 sm:$0xff]  }
  0x58   : > { %843 = vmatprep.mubr.msk.bf16.mxu1 %vm1103_vm0, %v1102_v1  ;;  %276 = vmatprep.subr.bf16.mxu0 %v945_v2  ;;  %v948_v4 = vld [vmem:[#allocation5 + $0x2c] ss:$20 sps:$4 sm:$0xff]   ;;  %v951_v10 = vld [vmem:[#allocation5 + $0x8] ss:$20 sps:$4 sm:$0xff]   ;;  %v954_v12 = vld [vmem:[#allocation5 + $0x30] ss:$20 sps:$4 sm:$0xff]  }
  0x59   : > { %v205_v6 = vld [vmem:[%s177_s9] sm:$0xff]  ;;  %277 = vmatpush1.bf16.msra.mxu0 %v947_v3  ;;  %v206_v7 = vld [vmem:[%s177_s9 + $0x8] sm:$0xff]  ;;  %s1104_s18 = smov 104   ;;  %s1105_s20 = smov 120   ;;  %vm458_vm2 = vcmask 130048  }
  0x5a   : > { %278 = vmatprep.subr.bf16.mxu0 %v948_v4  ;;  %v953_v8 = vld [vmem:[#allocation5 + $0xc] ss:$20 sps:$4 sm:$0xff]   ;;  %v207_v9 = vpack.c.bf16 %v206_v7, %v205_v6  ;;  %v956_v11 = vld [vmem:[#allocation5 + $0x34] ss:$20 sps:$4 sm:$0xff]   ;;  %v957_v13 = vld [vmem:[#allocation5 + $0x10] ss:$20 sps:$4 sm:$0xff]  }
  0x5b   : > { %v958_v14 = vld [vmem:[#allocation5 + $0x38] ss:$20 sps:$4 sm:$0xff]   ;;  %s1106_s4 = smov 112   ;;  %s798_s25 = sshll.u32 %s1267_s6, 3  ;;  %v812_v3 = vld [vmem:[%s1369_s2] ss:$0 sm:$0xff] }
  0x5c   : > { %s818_s10 = sshll.u32 %s1149_s16, 7  ;;  %s203_s11 = scalar_lea.vmem [#allocation7], %s798_s25 }
  0x5d   : > { %279 = vmatpush1.bf16.msra.mxu0 %v950_v5  ;;  %s708_s27 = sshll.u32 %s203_s11, 4  ;;  %s1323_s23 = scalar_lea.hbm %s1370_s3, %s818_s10  ;;  %s1325_s27 = int_to_ptr.vmem [resolvable:$true] %s708_s27 }
  0x5e   : > { %319 = vmatprep.subr.bf16.mxu0 %v953_v8  ;;  %s695_s30 = scalar_lea.sflag [#allocation4], %s1267_s6  ;;  %s1023_s16 = scalar_lea.vmem %s1325_s27, 128 }
  0x5f   : > { %p1024_p4 = scmp.ne.s32.totalorder %s1325_s27, %s1023_s16  ;;  %s1107_s22 = smov [#allocation7]  }
  0x60   : > { %809 = vmatmul.mubr.msk.bf16.vlgmr.msra.gmra.mrb[0].mxu0 %vm272_vm1, %v207_v9  ;;  %s1027_s7 = sshll.u32 %s1107_s22, 4  ;;  %s1028_s7 = int_to_ptr.vmem [resolvable:$false] %s1027_s7 }
  0x61   : > { %320 = vmatpush1.bf16.msra.mxu0 %v951_v10  ;;  %351 = vmatprep.mubr.bf16.mxu0 %v1101_v0  ;;  %p1025_p6 = pnand %p1024_p4, %p1219_p12  ;;  %s1029_s8 = scalar_lea.vmem %s1028_s7, 256 }
  0x62   : > { %321 = vmatprep.subr.bf16.mxu0 %v956_v11  ;;  %p1030_p10 = scmp.lt.s32.totalorder %s1325_s27, %s1028_s7  ;;  %p1031_p13 = scmp.lt.s32.totalorder %s1029_s8, %s1023_s16 }
  0x63   : > { %p1026_p8 = pneg %p1025_p6 }
  0x64   : > { %p1032_p3 = por %p1031_p13, %p1030_p10 }
  0x65   : > { %322 = vmatpush1.bf16.msra.mxu0 %v954_v12 }
  0x66   : > { %833 = vmatprep.subr.bf16.mxu0 %v1102_v1  ;;  %p1033_p7 = pnand %p1032_p3, %p1026_p8 }
  0x68   : > { %810 = vmatmul.mubr.msk.bf16.vlgmr.msra.gmra.mrb[4].mxu0 %vm272_vm1, %v207_v9 }
  0x69   : > { %834 = vmatpush3.bf16.msra.mxu0 %v957_v13  ;;  %837 = vmatprep.mubr.msk.bf16.mxu0 %vm1103_vm0, %v1102_v1 }
  0x6a   : > { %835 = vmatprep.subr.bf16.mxu0 %v1102_v1 }
  0x6d   : > { %836 = vmatpush3.bf16.msra.mxu0 %v958_v14 }
  0x70   : > { %838 = vmatmul.mubr.msk.bf16.vlgmr.msra.gmra.mrb[8].mxu0 %vm272_vm1, %v207_v9 }
 0x133   : > { %v310_v15 = vpop.f32.mrb[0].mxu0 }
 0x134   : > { %v1289_v16 = vpop.f32.mrb[1].mxu0 }
 0x135   : > { %v314_v17 = vpop.f32.mrb[2].mxu0 }
 0x136   : > { %v431_v18 = vpack.c.bf16 %v314_v17, %v310_v15  ;;  %v316_v19 = vpop.f32.mrb[3].mxu0 }
 0x137   : > { %v432_v20 = vpack.c.bf16 %v316_v19, %v1289_v16 }
 0x138   : > { %842 = vmatpush3.bf16.msra.mxu1 %v431_v18 }
 0x139   : > { %847 = vmatprep.subr.bf16.mxu1 %v1102_v1 }
 0x13b   : > { %v353_v21 = vpop.f32.mrb[4].mxu0 }
 0x13c   : > { %v1293_v22 = vpop.f32.mrb[5].mxu0 }
 0x13d   : > { %v357_v23 = vpop.f32.mrb[6].mxu0 }
 0x13e   : > { %v433_v24 = vpack.c.bf16 %v357_v23, %v353_v21  ;;  %v1295_v25 = vpop.f32.mrb[7].mxu0 }
 0x13f   : > { %v434_v26 = vpack.c.bf16 %v1295_v25, %v1293_v22 }
 0x143   : > { %v396_v27 = vpop.f32.mrb[8].mxu0 }
 0x144   : > { %v839_v28 = vpop.f32.mrb[9].mxu0  ;;  %v403_v30 = vsel %vm272_vm1, %v396_v27, -inf }
 0x145   : > { %v399_v29 = vpop.f32.mrb[10].mxu0 }
 0x146   : > { %v404_v31 = vsel %vm272_vm1, %v399_v29, -inf  ;;  %v840_v32 = vpop.f32.mrb[11].mxu0 }
 0x147   : > { %v405_v33 = vmax.f32 %v403_v30, %v404_v31 }
 0x149   : > { %v406_v34 = vrot.slane %v405_v33, 4 }
 0x14b   : > { %v407_v35 = vmax.f32 %v405_v33, %v406_v34 }
 0x14d   : > { %v408_v36 = vrot.slane %v407_v35, 2 }
 0x14f   : > { %v409_v37 = vmax.f32 %v407_v35, %v408_v36 }
 0x151   : > { %v410_v38 = vrot.slane %v409_v37, 1 }
 0x153   : > { %v411_v39 = vmax.f32 %v409_v37, %v410_v38 }
 0x155   : > { %v412_v40 = vsub.f32 %v396_v27, %v411_v39  ;;  %v413_v41 = vsub.f32 %v399_v29, %v411_v39 }
 0x157   : > { %v414_v42 = vmul.f32 1.442695, %v412_v40  ;;  %v416_v43 = vmul.f32 1.442695, %v413_v41 }
 0x159   : > { %959 = vpow2.f32 %v414_v42 }
 0x15a   : > { %961 = vpow2.f32 %v416_v43 }
 0x163   : > { %v960_v44 = vpop.eup %959 }
 0x164   : > { %v962_v45 = vpop.eup %961  ;;  %v418_v46 = vsel %vm272_vm1, %v960_v44, 0.0 }
 0x165   : > { %v419_v47 = vsel %vm272_vm1, %v962_v45, 0.0 }
 0x166   : > { %v420_v48 = vadd.f32 %v419_v47, %v418_v46 }
 0x168   : > { %v421_v49 = vrot.slane %v420_v48, 4 }
 0x16a   : > { %v422_v50 = vadd.f32 %v421_v49, %v420_v48 }
 0x16c   : > { %v423_v51 = vrot.slane %v422_v50, 2 }
 0x16e   : > { %v424_v52 = vadd.f32 %v423_v51, %v422_v50 }
 0x170   : > { %v425_v53 = vrot.slane %v424_v52, 1 }
 0x172   : > { %v426_v54 = vadd.f32 %v425_v53, %v424_v52 }
 0x174   : > { %963 = vrcp.f32 %v426_v54 }
 0x17e   : > { %v964_v55 = vpop.eup %963 }
 0x17f   : > { %v428_v56 = vmul.f32 %v964_v55, %v960_v44  ;;  %v429_v57 = vmul.f32 %v964_v55, %v962_v45 }
 0x181   : > { %v430_v58 = vpack.c.bf16 %v429_v57, %v428_v56 }
 0x183   : > { %630 = vrot.lane.b32.xlu1 %v430_v58, %s1104_s18  ;;  %504 = vrot.lane.b32.xlu0 %v430_v58, %s1105_s20 }
 0x187   : > { %567 = vrot.lane.b32.xlu0 %v430_v58, %s1106_s4 }
 0x1a6   : > { %442 = vxpose.xlu1.c.b16.start.end [1/1] (short) (narrow) %v430_v58, 16 }
 0x1f5   : > { %v631_v59 = vpop.permute.xlu1 %630  ;;  %v505_v60 = vpop.permute.xlu0 %504 }
 0x1f6   : > { %633 = vxpose.xlu1.c.b16.start.end [1/1] (short) (narrow) %v631_v59, 16  ;;  %507 = vxpose.xlu0.c.b16.start.end [1/1] (short) (narrow) %v505_v60, 16 }
 0x1f9   : > { %v568_v61 = vpop.permute.xlu0 %567 }
 0x1fa   : > { %570 = vxpose.xlu0.c.b16.start.end [1/1] (short) (narrow) %v568_v61, 16 }
 0x20c   : > { %v450_v62 = vpop.trf.xlu1 }
 0x20d   : > { %844 = vmatmul.mubr.msk.bf16.vlgmr.msra.gmra.mrb[0].mxu1 %vm458_vm2, %v450_v62 }
 0x20e   : > { %848 = vmatpush3.bf16.msra.mxu1 %v432_v20  ;;  %849 = vmatprep.mubr.msk.bf16.mxu1 %vm1103_vm0, %v1102_v1 }
 0x20f   : > { %853 = vmatprep.subr.bf16.mxu1 %v1102_v1 }
 0x25c   : > { %v515_v63 = vpop.trf.xlu0  ;;  %v641_v2 = vpop.trf.xlu1 }
 0x25d   : > { %850 = vmatmul.mubr.msk.bf16.vlgmr.msra.gmra.mrb[0].mxu1 %vm458_vm2, %v515_v63 }
 0x25e   : > { %854 = vmatpush3.bf16.msra.mxu1 %v433_v24  ;;  %855 = vmatprep.mubr.msk.bf16.mxu1 %vm1103_vm0, %v1102_v1 }
 0x25f   : > { %859 = vmatprep.subr.bf16.mxu1 %v1102_v1 }
 0x260   : > { %v578_v0 = vpop.trf.xlu0 }
 0x269   : > { %856 = vmatmul.mubr.msk.bf16.vlgmr.msra.gmra.mrb[0].mxu1 %vm458_vm2, %v578_v0 }
 0x26a   : > { %860 = vmatpush3.bf16.msra.mxu1 %v434_v26  ;;  %861 = vmatprep.mubr.msk.bf16.mxu1 %vm1103_vm0, %v1102_v1 }
 0x275   : > { %862 = vmatmul.mubr.msk.bf16.vlgmr.msra.gmra.mrb[0].mxu1 %vm458_vm2, %v641_v2 }
 0x348   : > { %v686_v4 = vpop.f32.mrb[0].mxu1 }
 0x349   : > { %v865_v5 = vadd.f32 %v812_v3, %v686_v4  ;;  %v863_v6 = vpop.f32.mrb[1].mxu1 }
 0x34a   : > { %v689_v1 = vpop.f32.mrb[2].mxu1 }
 0x34b   : > { %693 = vst [vmem:[%s203_s11] sm:$0xff] %v865_v5  ;;  %v864_v7 = vpop.f32.mrb[3].mxu1 }
 0x34c   : > { %1036 = shalt.err (!%p1033_p7)
}
 0x34d   : > { %s1037_s6 = scalar_lea.hbm %s1323_s23, 128  ;;  %s1041_s20 = scalar_lea.hbm %s1370_s3, 256 }
 0x34e   : > { %p1038_p9 = scmp.ne.s32.totalorder %s1323_s23, %s1037_s6  ;;  %p1042_p5 = scmp.lt.u32.totalorder %s1323_s23, %s1370_s3 }
 0x34f   : > { %p1043_p1 = scmp.lt.u32.totalorder %s1041_s20, %s1037_s6  ;;  %p1045_p4 = scmp.lt.u32.totalorder %s1037_s6, %s1323_s23 }
 0x350   : > { %p1039_p2 = pnand %p1038_p9, %p1219_p12 }
 0x351   : > { %p1044_p11 = por %p1043_p1, %p1042_p5 }
 0x352   : > { %p1040_p0 = pneg %p1039_p2 }
 0x353   : > { %p1046_p6 = por %p1045_p4, %p1044_p11 }
 0x355   : > { %p1047_p8 = pnand %p1046_p6, %p1040_p0 }
 0x357   : > { %1050 = shalt.err (!%p1047_p8)
}
 0x358   : > { %884 = dma.vmem_to_hbm [thread:$0]  (%p1219_p12), %s1325_s27, 128, %s1323_s23, %s695_s30  }
 0x359 PF: > { %s720_s26 = sand.u32 1, %s1081_s12   ;;  %p1385_p10 = scmp.ne.s32.totalorder %s1375_s19, 0 }
 0x35a   : > { %p1386_p13 = scmp.ge.s32.totalorder %s1093_s15, 2  ;;  %s721_s5 = scalar_lea.sflag [#allocation4], %s720_s26 }
 0x35c   : > { %p895_p3 = pnand %p1386_p13, %p1385_p10 }
 0x35e   : > { %1076 = dma.done.wait (!%p895_p3), %s721_s5, 128  }
 0x35f   : > { %1078 = vsyncadd (!%p895_p3), %s721_s5, 4294967168  ;;  %p17_p7 = scmp.ge.s32.totalorder %s1184_s24, 4   ;;  %s1387_s12 = smov %s1085_s13 }
 0x360   : > { %s1388_s13 = smov %s1089_s14  ;;  %s1389_s14 = smov %s1215_s17 }
 0x361   : > { %s1390_s15 = smov %s1184_s24  ;;  %19 = sbr.rel (!%p17_p7) target bundleno = 6 (0x6), region = 81 }
 0x368   :  { %726 = vsyncpa [#allocation3], 1 }
 0x369   :  { %728 = vsyncpa [#allocation3 + $0x1], 1 }
 0x36a   :  { %729 = vsyncpa [#allocation6], 1 }
 0x36b   :  { %730 = vsyncpa [#allocation4], 1 }
 0x36c   :  { %732 = vsyncpa [#allocation4 + $0x1], 1 }

</bundles_post_ra>
